<compile_context>
chip_gen: v5e
topology: v5e:2x2
jax: 0.10.0
libtpu: 0.0.40
codegen_flags: <defaults>
</compile_context>

<pallas_src>
import jax
import jax.numpy as jnp
from jax import lax
from jax.experimental import pallas as pl
from jax.experimental.pallas import tpu as pltpu

EPS = 1e-5


# ------------------------------- helpers ----------------------------------- #

def _fold_bn(gamma, beta, mean, var):
    scale = gamma / jnp.sqrt(var + EPS)
    bias = beta - mean * scale
    return scale[None, :].astype(jnp.float32), bias[None, :].astype(jnp.float32)


def _pick_tile(n, max_tile=8):
    """Largest divisor of n that is <= max_tile, preferring >=2 row tiles."""
    max_tile = min(max_tile, max(n // 2, 1))
    for d in range(max_tile, 0, -1):
        if n % d == 0:
            return d
    return 1


def _compiler_params():
    return pltpu.CompilerParams(
        dimension_semantics=("parallel", "parallel"),
        vmem_limit_bytes=32 * 1024 * 1024)


# ----------------------------- Pallas kernels ------------------------------ #

def _conv3x3_s2_fused_down_kernel(xph_ref, w1_ref, s1_ref, b1_ref,
                                  wd_ref, sd_ref, bd_ref,
                                  out_ref, id_ref, patch_ref):
    # xph_ref : (1, 4*(Ho+1), Wo+1, Cin)  4 stride-2 phases of the zero-padded
    #           input, stacked along rows; phase p = 2*(row parity)+(col parity)
    #           lives in rows [p*(Ho+1), (p+1)*(Ho+1)).
    # w1_ref  : (9*Cin, Cout) im2col 3x3 weights, row = (kh*3 + kw)*Cin + cin
    # wd_ref  : (Cin, Cout)   1x1 downsample weights
    # out_ref : (1, TILE, Wo, Cout)  relu(bn1(conv1(x))) row tile
    # id_ref  : (1, TILE, Wo, Cout)  bn_d(conv_d(x))     row tile
    # patch_ref: (TILE*Wo, 9*Cin) f32 VMEM im2col scratch
    TILE, Wo, Cout = out_ref.shape[1], out_ref.shape[2], out_ref.shape[3]
    Cin = xph_ref.shape[3]
    Hp = xph_ref.shape[1] // 4           # = Ho + 1
    oh0 = pl.multiple_of(pl.program_id(1) * TILE, TILE)

    # Build the im2col patch buffer once for this row tile (unit-stride windows).
    for kh in range(3):
        for kw in range(3):
            ph = 2 * (kh % 2) + (kw % 2)
            dh, dw = kh // 2, kw // 2
            win = xph_ref[0, pl.ds(ph * Hp + oh0 + dh, TILE), dw:dw + Wo, :]
            c0 = (kh * 3 + kw) * Cin
            patch_ref[:, c0:c0 + Cin] = win.reshape(TILE * Wo, Cin)

    y = jnp.dot(patch_ref[...], w1_ref[...], preferred_element_type=jnp.float32)
    y = jnp.maximum(y * s1_ref[...] + b1_ref[...], 0.0)
    out_ref[0] = y.reshape(TILE, Wo, Cout).astype(out_ref.dtype)

    # Fused downsample: x[2*oh, 2*ow] == padded-x[2*oh+1, 2*ow+1] == phase (1,1).
    xi = xph_ref[0, pl.ds(3 * Hp + oh0, TILE), 0:Wo, :].reshape(TILE * Wo, Cin)
    yi = jnp.dot(xi, wd_ref[...], preferred_element_type=jnp.float32)
    yi = yi * sd_ref[...] + bd_ref[...]
    id_ref[0] = yi.reshape(TILE, Wo, Cout).astype(id_ref.dtype)


def _conv3x3_s1_bn_relu_kernel(xp_ref, w_ref, s_ref, b_ref, out_ref, patch_ref):
    # xp_ref: (1, H+2, W+2, Cin) zero-padded input (resident across row tiles)
    # out_ref: (1, TILE, W, Cout); patch_ref: (TILE*W, 9*Cin) f32 scratch
    TILE, Wo, Cout = out_ref.shape[1], out_ref.shape[2], out_ref.shape[3]
    Cin = xp_ref.shape[3]
    oh0 = pl.multiple_of(pl.program_id(1) * TILE, TILE)
    for kh in range(3):
        for kw in range(3):
            win = xp_ref[0, pl.ds(oh0 + kh, TILE), kw:kw + Wo, :]
            c0 = (kh * 3 + kw) * Cin
            patch_ref[:, c0:c0 + Cin] = win.reshape(TILE * Wo, Cin)
    y = jnp.dot(patch_ref[...], w_ref[...], preferred_element_type=jnp.float32)
    y = jnp.maximum(y * s_ref[...] + b_ref[...], 0.0)
    out_ref[0] = y.reshape(TILE, Wo, Cout).astype(out_ref.dtype)


def _conv3x3_s1_bn_add_relu_kernel(xp_ref, w_ref, s_ref, b_ref, res_ref,
                                   out_ref, patch_ref):
    # Same as above but fuses the residual add and the final ReLU.
    TILE, Wo, Cout = out_ref.shape[1], out_ref.shape[2], out_ref.shape[3]
    Cin = xp_ref.shape[3]
    oh0 = pl.multiple_of(pl.program_id(1) * TILE, TILE)
    for kh in range(3):
        for kw in range(3):
            win = xp_ref[0, pl.ds(oh0 + kh, TILE), kw:kw + Wo, :]
            c0 = (kh * 3 + kw) * Cin
            patch_ref[:, c0:c0 + Cin] = win.reshape(TILE * Wo, Cin)
    y = jnp.dot(patch_ref[...], w_ref[...], preferred_element_type=jnp.float32)
    y = y * s_ref[...] + b_ref[...]
    y = y + res_ref[0].reshape(TILE * Wo, Cout).astype(jnp.float32)
    y = jnp.maximum(y, 0.0)
    out_ref[0] = y.reshape(TILE, Wo, Cout).astype(out_ref.dtype)


# ------------------------------ JAX wrappers -------------------------------- #

def conv3x3_s2_bn_relu_with_downsample(x, w_hwio, scale, bias, wd_io, sd, bd):
    """conv1 (3x3, stride 2, pad 1) + bn1 + relu, fused with the 1x1 stride-2
    downsample conv + bn. Returns (main, identity), both (B, H/2, W/2, Cout)."""
    B, H, W, Cin = x.shape
    Cout = w_hwio.shape[-1]
    assert H % 2 == 0 and W % 2 == 0, "stride-2 path assumes even H, W"
    Ho, Wo = H // 2, W // 2

    # Zero-pad by 1, then split into the 4 stride-2 phases, stacked along rows:
    #   xph[b, (2*rp+cp)*(Ho+1) + i, j, c] == xpad[b, 2*i + rp, 2*j + cp, c]
    xpad = jnp.pad(x, ((0, 0), (1, 1), (1, 1), (0, 0)))
    xph = xpad.reshape(B, Ho + 1, 2, Wo + 1, 2, Cin)
    xph = jnp.transpose(xph, (0, 2, 4, 1, 3, 5))
    xph = xph.reshape(B, 4 * (Ho + 1), Wo + 1, Cin)
    w_mat = w_hwio.reshape(9 * Cin, Cout)          # (kh, kw, cin) -> rows

    tile = _pick_tile(Ho)
    rows = tile * Wo
    flops = 2 * B * Ho * Wo * Cout * (9 * Cin + Cin)
    bytes_acc = 4 * (xph.size + w_mat.size + wd_io.size + 2 * B * Ho * Wo * Cout)

    out, ident = pl.pallas_call(
        _conv3x3_s2_fused_down_kernel,
        out_shape=(jax.ShapeDtypeStruct((B, Ho, Wo, Cout), jnp.float32),
                   jax.ShapeDtypeStruct((B, Ho, Wo, Cout), jnp.float32)),
        grid=(B, Ho // tile),
        in_specs=[
            pl.BlockSpec((1, 4 * (Ho + 1), Wo + 1, Cin), lambda b, t: (b, 0, 0, 0)),
            pl.BlockSpec((9 * Cin, Cout), lambda b, t: (0, 0)),
            pl.BlockSpec((1, Cout), lambda b, t: (0, 0)),
            pl.BlockSpec((1, Cout), lambda b, t: (0, 0)),
            pl.BlockSpec((Cin, Cout), lambda b, t: (0, 0)),
            pl.BlockSpec((1, Cout), lambda b, t: (0, 0)),
            pl.BlockSpec((1, Cout), lambda b, t: (0, 0)),
        ],
        out_specs=(pl.BlockSpec((1, tile, Wo, Cout), lambda b, t: (b, t, 0, 0)),
                   pl.BlockSpec((1, tile, Wo, Cout), lambda b, t: (b, t, 0, 0))),
        scratch_shapes=[pltpu.VMEM((rows, 9 * Cin), jnp.float32)],
        compiler_params=_compiler_params(),
        cost_estimate=pl.CostEstimate(flops=flops, transcendentals=0,
                                      bytes_accessed=bytes_acc),
    )(xph, w_mat, scale, bias, wd_io, sd, bd)
    return out, ident


def conv3x3_s1_bn_relu(x, w_hwio, scale, bias):
    B, H, W, Cin = x.shape
    Cout = w_hwio.shape[-1]
    xpad = jnp.pad(x, ((0, 0), (1, 1), (1, 1), (0, 0)))
    w_mat = w_hwio.reshape(9 * Cin, Cout)
    tile = _pick_tile(H)
    flops = 2 * B * H * W * Cout * 9 * Cin
    bytes_acc = 4 * (xpad.size + w_mat.size + B * H * W * Cout)
    return pl.pallas_call(
        _conv3x3_s1_bn_relu_kernel,
        out_shape=jax.ShapeDtypeStruct((B, H, W, Cout), jnp.float32),
        grid=(B, H // tile),
        in_specs=[
            pl.BlockSpec((1, H + 2, W + 2, Cin), lambda b, t: (b, 0, 0, 0)),
            pl.BlockSpec((9 * Cin, Cout), lambda b, t: (0, 0)),
            pl.BlockSpec((1, Cout), lambda b, t: (0, 0)),
            pl.BlockSpec((1, Cout), lambda b, t: (0, 0)),
        ],
        out_specs=pl.BlockSpec((1, tile, W, Cout), lambda b, t: (b, t, 0, 0)),
        scratch_shapes=[pltpu.VMEM((tile * W, 9 * Cin), jnp.float32)],
        compiler_params=_compiler_params(),
        cost_estimate=pl.CostEstimate(flops=flops, transcendentals=0,
                                      bytes_accessed=bytes_acc),
    )(xpad, w_mat, scale, bias)


def conv3x3_s1_bn_add_relu(x, w_hwio, scale, bias, residual):
    B, H, W, Cin = x.shape
    Cout = w_hwio.shape[-1]
    assert residual.shape == (B, H, W, Cout)
    xpad = jnp.pad(x, ((0, 0), (1, 1), (1, 1), (0, 0)))
    w_mat = w_hwio.reshape(9 * Cin, Cout)
    tile = _pick_tile(H)
    flops = 2 * B * H * W * Cout * 9 * Cin
    bytes_acc = 4 * (xpad.size + w_mat.size + residual.size + B * H * W * Cout)
    return pl.pallas_call(
        _conv3x3_s1_bn_add_relu_kernel,
        out_shape=jax.ShapeDtypeStruct((B, H, W, Cout), jnp.float32),
        grid=(B, H // tile),
        in_specs=[
            pl.BlockSpec((1, H + 2, W + 2, Cin), lambda b, t: (b, 0, 0, 0)),
            pl.BlockSpec((9 * Cin, Cout), lambda b, t: (0, 0)),
            pl.BlockSpec((1, Cout), lambda b, t: (0, 0)),
            pl.BlockSpec((1, Cout), lambda b, t: (0, 0)),
            pl.BlockSpec((1, tile, W, Cout), lambda b, t: (b, t, 0, 0)),
        ],
        out_specs=pl.BlockSpec((1, tile, W, Cout), lambda b, t: (b, t, 0, 0)),
        scratch_shapes=[pltpu.VMEM((tile * W, 9 * Cin), jnp.float32)],
        compiler_params=_compiler_params(),
        cost_estimate=pl.CostEstimate(flops=flops, transcendentals=0,
                                      bytes_accessed=bytes_acc),
    )(xpad, w_mat, scale, bias, residual)


def basic_block_forward(x_nchw, params, stride):
    """BasicBlock forward (eval-mode BN). Input/output are NCHW float32."""
    x = jnp.transpose(x_nchw, (0, 2, 3, 1)).astype(jnp.float32)   # NHWC

    w1 = jnp.transpose(params["conv1_w"], (2, 3, 1, 0))           # OIHW -> HWIO
    s1, b1 = _fold_bn(*params["bn1"])
    w2 = jnp.transpose(params["conv2_w"], (2, 3, 1, 0))
    s2, b2 = _fold_bn(*params["bn2"])

    if stride == 1:
        out = conv3x3_s1_bn_relu(x, w1, s1, b1)
        identity = x
    elif stride == 2:
        wd = jnp.transpose(params["down_w"][:, :, 0, 0], (1, 0))  # (Cin, Cout)
        sd, bd = _fold_bn(*params["bn_down"])
        out, identity = conv3x3_s2_bn_relu_with_downsample(x, w1, s1, b1, wd, sd, bd)
    else:
        # TODO(synk): generalize the phase decomposition to arbitrary stride;
        # ResNet BasicBlock only uses stride 1 or 2.
        raise NotImplementedError("stride must be 1 or 2")

    out = conv3x3_s1_bn_add_relu(out, w2, s2, b2, identity)
    return jnp.transpose(out, (0, 3, 1, 2))                       # back to NCHW


# ------------------------------ reference ----------------------------------- #

def _ref_basic_block(x, params, stride):
    def conv(x, w, s, pad):
        return lax.conv_general_dilated(
            x, w, (s, s), [(pad, pad), (pad, pad)],
            dimension_numbers=("NCHW", "OIHW", "NCHW"),
            precision=lax.Precision.HIGHEST)

    def bn(x, bnp):
        gamma, beta, mean, var = bnp
        scale = gamma / jnp.sqrt(var + EPS)
        bias = beta - mean * scale
        return x * scale[None, :, None, None] + bias[None, :, None, None]

    out = jax.nn.relu(bn(conv(x, params["conv1_w"], stride, 1), params["bn1"]))
    out = bn(conv(out, params["conv2_w"], 1, 1), params["bn2"])
    if stride != 1:
        identity = bn(conv(x, params["down_w"], stride, 0), params["bn_down"])
    else:
        identity = x
    return jax.nn.relu(out + identity)


# --------------------------------- main -------------------------------------- #

def _make_params(key, inplanes, planes, stride):
    keys = jax.random.split(key, 6)

    def bn_params(k, c):
        k1, k2, k3, k4 = jax.random.split(k, 4)
        gamma = jax.random.uniform(k1, (c,), minval=0.5, maxval=1.5)
        beta = jax.random.normal(k2, (c,)) * 0.1
        mean = jax.random.normal(k3, (c,)) * 0.1
        var = jax.random.uniform(k4, (c,), minval=0.5, maxval=1.5)
        return (gamma, beta, mean, var)

    params = {
        "conv1_w": jax.random.normal(keys[0], (planes, inplanes, 3, 3)) * 0.1,
        "bn1": bn_params(keys[1], planes),
        "conv2_w": jax.random.normal(keys[2], (planes, planes, 3, 3)) * 0.1,
        "bn2": bn_params(keys[3], planes),
    }
    if stride != 1:
        params["down_w"] = jax.random.normal(keys[4], (planes, inplanes, 1, 1)) * 0.1
        params["bn_down"] = bn_params(keys[5], planes)
    return params


if __name__ == "__main__":
    key = jax.random.PRNGKey(0)
    k_x, k_p1, k_p2 = jax.random.split(key, 3)

    # --- case 1: stride=2 with fused downsample branch ---
    B, inplanes, planes, H, W, stride = 2, 4, 8, 16, 16, 2
    x = jax.random.normal(k_x, (B, inplanes, H, W), dtype=jnp.float32)
    params = _make_params(k_p1, inplanes, planes, stride)
    out = jax.block_until_ready(basic_block_forward(x, params, stride))
    ref = _ref_basic_block(x, params, stride)
    assert out.shape == (B, planes, H // stride, W // stride)
    assert jnp.allclose(out, ref, rtol=1e-3, atol=1e-3), "stride=2 mismatch"

    # --- case 2: stride=1, identity shortcut ---
    params1 = _make_params(k_p2, planes, planes, 1)
    x1 = jax.random.normal(k_x, (B, planes, H, W), dtype=jnp.float32)
    out1 = jax.block_until_ready(basic_block_forward(x1, params1, 1))
    ref1 = _ref_basic_block(x1, params1, 1)
    assert out1.shape == (B, planes, H, W)
    assert jnp.allclose(out1, ref1, rtol=1e-3, atol=1e-3), "stride=1 mismatch"

    print("KERNEL_OK")
</pallas_src>

<mosaic_0001>
module attributes {stable_mosaic.version = 11 : i64} {
  func.func @_conv3x3_s2_fused_down_kernel(%arg0: i32, %arg1: i32, %arg2: memref<1x36x9x4xf32, #tpu.memory_space<vmem>>, %arg3: memref<36x8xf32, #tpu.memory_space<vmem>>, %arg4: memref<1x8xf32, #tpu.memory_space<vmem>>, %arg5: memref<1x8xf32, #tpu.memory_space<vmem>>, %arg6: memref<4x8xf32, #tpu.memory_space<vmem>>, %arg7: memref<1x8xf32, #tpu.memory_space<vmem>>, %arg8: memref<1x8xf32, #tpu.memory_space<vmem>>, %arg9: memref<1x4x8x8xf32, #tpu.memory_space<vmem>>, %arg10: memref<1x4x8x8xf32, #tpu.memory_space<vmem>>, %arg11: memref<32x36xf32, #tpu.memory_space<vmem>>) attributes {dimension_semantics = [#tpu.dimension_semantics<parallel>, #tpu.dimension_semantics<parallel>], iteration_bounds = array<i64: 2, 2>, scalar_prefetch = 0 : i64, scratch_operands = 1 : i64, tpu.core_type = #tpu.core_type<tc>, window_params = [{transform_indices = @transform_0, window_bounds = array<i64: 1, 36, 9, 4>}, {pipeline_mode = #tpu.pipeline_mode<synchronous>, transform_indices = @transform_1, window_bounds = array<i64: 36, 8>}, {pipeline_mode = #tpu.pipeline_mode<synchronous>, transform_indices = @transform_2, window_bounds = array<i64: 1, 8>}, {pipeline_mode = #tpu.pipeline_mode<synchronous>, transform_indices = @transform_3, window_bounds = array<i64: 1, 8>}, {pipeline_mode = #tpu.pipeline_mode<synchronous>, transform_indices = @transform_4, window_bounds = array<i64: 4, 8>}, {pipeline_mode = #tpu.pipeline_mode<synchronous>, transform_indices = @transform_5, window_bounds = array<i64: 1, 8>}, {pipeline_mode = #tpu.pipeline_mode<synchronous>, transform_indices = @transform_6, window_bounds = array<i64: 1, 8>}, {transform_indices = @transform_7, window_bounds = array<i64: 1, 4, 8, 8>}, {transform_indices = @transform_8, window_bounds = array<i64: 1, 4, 8, 8>}]} {
    %c4_i32 = arith.constant 4 : i32
    %0 = arith.muli %arg1, %c4_i32 : i32
    %1 = tpu.assume_multiple %0, 4 : i32
    %c0_i32 = arith.constant 0 : i32
    %2 = arith.addi %c0_i32, %1 : i32
    %c0_i32_0 = arith.constant 0 : i32
    %3 = arith.addi %2, %c0_i32_0 : i32
    %c0 = arith.constant 0 : index
    %4 = arith.index_cast %3 : i32 to index
    %c0_1 = arith.constant 0 : index
    %c0_2 = arith.constant 0 : index
    %5 = vector.load %arg2[%c0, %4, %c0_1, %c0_2] : memref<1x36x9x4xf32, #tpu.memory_space<vmem>>, vector<1x4x8x4xf32>
    %6 = vector.shape_cast %5 : vector<1x4x8x4xf32> to vector<4x8x4xf32>
    %7 = vector.shape_cast %6 : vector<4x8x4xf32> to vector<32x4xf32>
    %c0_3 = arith.constant 0 : index
    %c0_4 = arith.constant 0 : index
    %8 = vector.load %arg11[%c0_3, %c0_4] : memref<32x36xf32, #tpu.memory_space<vmem>>, vector<32x4xf32>
    tpu.vector_store %arg11[%c0_3, %c0_4], %7 {strides = array<i32>} : memref<32x36xf32, #tpu.memory_space<vmem>>, vector<32x4xf32>,
    %c9_i32 = arith.constant 9 : i32
    %9 = arith.addi %c9_i32, %1 : i32
    %c0_i32_5 = arith.constant 0 : i32
    %10 = arith.addi %9, %c0_i32_5 : i32
    %c0_6 = arith.constant 0 : index
    %11 = arith.index_cast %10 : i32 to index
    %c0_7 = arith.constant 0 : index
    %c0_8 = arith.constant 0 : index
    %12 = vector.load %arg2[%c0_6, %11, %c0_7, %c0_8] : memref<1x36x9x4xf32, #tpu.memory_space<vmem>>, vector<1x4x8x4xf32>
    %13 = vector.shape_cast %12 : vector<1x4x8x4xf32> to vector<4x8x4xf32>
    %14 = vector.shape_cast %13 : vector<4x8x4xf32> to vector<32x4xf32>
    %c0_9 = arith.constant 0 : index
    %c4 = arith.constant 4 : index
    %15 = vector.load %arg11[%c0_9, %c4] : memref<32x36xf32, #tpu.memory_space<vmem>>, vector<32x4xf32>
    tpu.vector_store %arg11[%c0_9, %c4], %14 {strides = array<i32>} : memref<32x36xf32, #tpu.memory_space<vmem>>, vector<32x4xf32>,
    %c0_i32_10 = arith.constant 0 : i32
    %16 = arith.addi %c0_i32_10, %1 : i32
    %c0_i32_11 = arith.constant 0 : i32
    %17 = arith.addi %16, %c0_i32_11 : i32
    %c0_12 = arith.constant 0 : index
    %18 = arith.index_cast %17 : i32 to index
    %c1 = arith.constant 1 : index
    %c0_13 = arith.constant 0 : index
    %19 = vector.load %arg2[%c0_12, %18, %c1, %c0_13] : memref<1x36x9x4xf32, #tpu.memory_space<vmem>>, vector<1x4x8x4xf32>
    %20 = vector.shape_cast %19 : vector<1x4x8x4xf32> to vector<4x8x4xf32>
    %21 = vector.shape_cast %20 : vector<4x8x4xf32> to vector<32x4xf32>
    %c0_14 = arith.constant 0 : index
    %c8 = arith.constant 8 : index
    %22 = vector.load %arg11[%c0_14, %c8] : memref<32x36xf32, #tpu.memory_space<vmem>>, vector<32x4xf32>
    tpu.vector_store %arg11[%c0_14, %c8], %21 {strides = array<i32>} : memref<32x36xf32, #tpu.memory_space<vmem>>, vector<32x4xf32>,
    %c18_i32 = arith.constant 18 : i32
    %23 = arith.addi %c18_i32, %1 : i32
    %c0_i32_15 = arith.constant 0 : i32
    %24 = arith.addi %23, %c0_i32_15 : i32
    %c0_16 = arith.constant 0 : index
    %25 = arith.index_cast %24 : i32 to index
    %c0_17 = arith.constant 0 : index
    %c0_18 = arith.constant 0 : index
    %26 = vector.load %arg2[%c0_16, %25, %c0_17, %c0_18] : memref<1x36x9x4xf32, #tpu.memory_space<vmem>>, vector<1x4x8x4xf32>
    %27 = vector.shape_cast %26 : vector<1x4x8x4xf32> to vector<4x8x4xf32>
    %28 = vector.shape_cast %27 : vector<4x8x4xf32> to vector<32x4xf32>
    %c0_19 = arith.constant 0 : index
    %c12 = arith.constant 12 : index
    %29 = vector.load %arg11[%c0_19, %c12] : memref<32x36xf32, #tpu.memory_space<vmem>>, vector<32x4xf32>
    tpu.vector_store %arg11[%c0_19, %c12], %28 {strides = array<i32>} : memref<32x36xf32, #tpu.memory_space<vmem>>, vector<32x4xf32>,
    %c27_i32 = arith.constant 27 : i32
    %30 = arith.addi %c27_i32, %1 : i32
    %c0_i32_20 = arith.constant 0 : i32
    %31 = arith.addi %30, %c0_i32_20 : i32
    %c0_21 = arith.constant 0 : index
    %32 = arith.index_cast %31 : i32 to index
    %c0_22 = arith.constant 0 : index
    %c0_23 = arith.constant 0 : index
    %33 = vector.load %arg2[%c0_21, %32, %c0_22, %c0_23] : memref<1x36x9x4xf32, #tpu.memory_space<vmem>>, vector<1x4x8x4xf32>
    %34 = vector.shape_cast %33 : vector<1x4x8x4xf32> to vector<4x8x4xf32>
    %35 = vector.shape_cast %34 : vector<4x8x4xf32> to vector<32x4xf32>
    %c0_24 = arith.constant 0 : index
    %c16 = arith.constant 16 : index
    %36 = vector.load %arg11[%c0_24, %c16] : memref<32x36xf32, #tpu.memory_space<vmem>>, vector<32x4xf32>
    tpu.vector_store %arg11[%c0_24, %c16], %35 {strides = array<i32>} : memref<32x36xf32, #tpu.memory_space<vmem>>, vector<32x4xf32>,
    %c18_i32_25 = arith.constant 18 : i32
    %37 = arith.addi %c18_i32_25, %1 : i32
    %c0_i32_26 = arith.constant 0 : i32
    %38 = arith.addi %37, %c0_i32_26 : i32
    %c0_27 = arith.constant 0 : index
    %39 = arith.index_cast %38 : i32 to index
    %c1_28 = arith.constant 1 : index
    %c0_29 = arith.constant 0 : index
    %40 = vector.load %arg2[%c0_27, %39, %c1_28, %c0_29] : memref<1x36x9x4xf32, #tpu.memory_space<vmem>>, vector<1x4x8x4xf32>
    %41 = vector.shape_cast %40 : vector<1x4x8x4xf32> to vector<4x8x4xf32>
    %42 = vector.shape_cast %41 : vector<4x8x4xf32> to vector<32x4xf32>
    %c0_30 = arith.constant 0 : index
    %c20 = arith.constant 20 : index
    %43 = vector.load %arg11[%c0_30, %c20] : memref<32x36xf32, #tpu.memory_space<vmem>>, vector<32x4xf32>
    tpu.vector_store %arg11[%c0_30, %c20], %42 {strides = array<i32>} : memref<32x36xf32, #tpu.memory_space<vmem>>, vector<32x4xf32>,
    %c0_i32_31 = arith.constant 0 : i32
    %44 = arith.addi %c0_i32_31, %1 : i32
    %c1_i32 = arith.constant 1 : i32
    %45 = arith.addi %44, %c1_i32 : i32
    %c0_32 = arith.constant 0 : index
    %46 = arith.index_cast %45 : i32 to index
    %c0_33 = arith.constant 0 : index
    %c0_34 = arith.constant 0 : index
    %47 = vector.load %arg2[%c0_32, %46, %c0_33, %c0_34] : memref<1x36x9x4xf32, #tpu.memory_space<vmem>>, vector<1x4x8x4xf32>
    %48 = vector.shape_cast %47 : vector<1x4x8x4xf32> to vector<4x8x4xf32>
    %49 = vector.shape_cast %48 : vector<4x8x4xf32> to vector<32x4xf32>
    %c0_35 = arith.constant 0 : index
    %c24 = arith.constant 24 : index
    %50 = vector.load %arg11[%c0_35, %c24] : memref<32x36xf32, #tpu.memory_space<vmem>>, vector<32x4xf32>
    tpu.vector_store %arg11[%c0_35, %c24], %49 {strides = array<i32>} : memref<32x36xf32, #tpu.memory_space<vmem>>, vector<32x4xf32>,
    %c9_i32_36 = arith.constant 9 : i32
    %51 = arith.addi %c9_i32_36, %1 : i32
    %c1_i32_37 = arith.constant 1 : i32
    %52 = arith.addi %51, %c1_i32_37 : i32
    %c0_38 = arith.constant 0 : index
    %53 = arith.index_cast %52 : i32 to index
    %c0_39 = arith.constant 0 : index
    %c0_40 = arith.constant 0 : index
    %54 = vector.load %arg2[%c0_38, %53, %c0_39, %c0_40] : memref<1x36x9x4xf32, #tpu.memory_space<vmem>>, vector<1x4x8x4xf32>
    %55 = vector.shape_cast %54 : vector<1x4x8x4xf32> to vector<4x8x4xf32>
    %56 = vector.shape_cast %55 : vector<4x8x4xf32> to vector<32x4xf32>
    %c0_41 = arith.constant 0 : index
    %c28 = arith.constant 28 : index
    %57 = vector.load %arg11[%c0_41, %c28] : memref<32x36xf32, #tpu.memory_space<vmem>>, vector<32x4xf32>
    tpu.vector_store %arg11[%c0_41, %c28], %56 {strides = array<i32>} : memref<32x36xf32, #tpu.memory_space<vmem>>, vector<32x4xf32>,
    %c0_i32_42 = arith.constant 0 : i32
    %58 = arith.addi %c0_i32_42, %1 : i32
    %c1_i32_43 = arith.constant 1 : i32
    %59 = arith.addi %58, %c1_i32_43 : i32
    %c0_44 = arith.constant 0 : index
    %60 = arith.index_cast %59 : i32 to index
    %c1_45 = arith.constant 1 : index
    %c0_46 = arith.constant 0 : index
    %61 = vector.load %arg2[%c0_44, %60, %c1_45, %c0_46] : memref<1x36x9x4xf32, #tpu.memory_space<vmem>>, vector<1x4x8x4xf32>
    %62 = vector.shape_cast %61 : vector<1x4x8x4xf32> to vector<4x8x4xf32>
    %63 = vector.shape_cast %62 : vector<4x8x4xf32> to vector<32x4xf32>
    %c0_47 = arith.constant 0 : index
    %c32 = arith.constant 32 : index
    %64 = vector.load %arg11[%c0_47, %c32] : memref<32x36xf32, #tpu.memory_space<vmem>>, vector<32x4xf32>
    tpu.vector_store %arg11[%c0_47, %c32], %63 {strides = array<i32>} : memref<32x36xf32, #tpu.memory_space<vmem>>, vector<32x4xf32>,
    %c0_48 = arith.constant 0 : index
    %c0_49 = arith.constant 0 : index
    %65 = vector.load %arg11[%c0_48, %c0_49] : memref<32x36xf32, #tpu.memory_space<vmem>>, vector<32x36xf32>
    %c0_50 = arith.constant 0 : index
    %c0_51 = arith.constant 0 : index
    %66 = vector.load %arg3[%c0_50, %c0_51] : memref<36x8xf32, #tpu.memory_space<vmem>>, vector<36x8xf32>
    %cst = arith.constant dense<0.000000e+00> : vector<32x8xf32>
    %67 = tpu.matmul %65, %66, %cst {dimension_numbers = #tpu.dot_dimension_numbers<[1], [0], [0], [1], [0, 0, 1, 1], [], []>} : vector<32x36xf32>, vector<36x8xf32>, vector<32x8xf32> -> vector<32x8xf32>
    %c0_52 = arith.constant 0 : index
    %c0_53 = arith.constant 0 : index
    %68 = vector.load %arg4[%c0_52, %c0_53] : memref<1x8xf32, #tpu.memory_space<vmem>>, vector<1x8xf32>
    %69 = vector.broadcast %68 : vector<1x8xf32> to vector<32x8xf32>
    %70 = arith.mulf %67, %69 : vector<32x8xf32>
    %c0_54 = arith.constant 0 : index
    %c0_55 = arith.constant 0 : index
    %71 = vector.load %arg5[%c0_54, %c0_55] : memref<1x8xf32, #tpu.memory_space<vmem>>, vector<1x8xf32>
    %72 = vector.broadcast %71 : vector<1x8xf32> to vector<32x8xf32>
    %73 = arith.addf %70, %72 : vector<32x8xf32>
    %cst_56 = arith.constant 0.000000e+00 : f32
    %74 = vector.broadcast %cst_56 : f32 to vector<32x8xf32>
    %75 = arith.maximumf %73, %74 : vector<32x8xf32>
    %76 = vector.shape_cast %75 : vector<32x8xf32> to vector<4x8x8xf32>
    %c0_57 = arith.constant 0 : index
    %c0_58 = arith.constant 0 : index
    %c0_59 = arith.constant 0 : index
    %c0_60 = arith.constant 0 : index
    %77 = vector.load %arg9[%c0_57, %c0_58, %c0_59, %c0_60] : memref<1x4x8x8xf32, #tpu.memory_space<vmem>>, vector<1x4x8x8xf32>
    %78 = vector.shape_cast %77 : vector<1x4x8x8xf32> to vector<4x8x8xf32>
    %79 = vector.shape_cast %76 : vector<4x8x8xf32> to vector<1x4x8x8xf32>
    tpu.vector_store %arg9[%c0_57, %c0_58, %c0_59, %c0_60], %79 {strides = array<i32>} : memref<1x4x8x8xf32, #tpu.memory_space<vmem>>, vector<1x4x8x8xf32>,
    %c27_i32_61 = arith.constant 27 : i32
    %80 = arith.addi %c27_i32_61, %1 : i32
    %c0_62 = arith.constant 0 : index
    %81 = arith.index_cast %80 : i32 to index
    %c0_63 = arith.constant 0 : index
    %c0_64 = arith.constant 0 : index
    %82 = vector.load %arg2[%c0_62, %81, %c0_63, %c0_64] : memref<1x36x9x4xf32, #tpu.memory_space<vmem>>, vector<1x4x8x4xf32>
    %83 = vector.shape_cast %82 : vector<1x4x8x4xf32> to vector<4x8x4xf32>
    %84 = vector.shape_cast %83 : vector<4x8x4xf32> to vector<32x4xf32>
    %c0_65 = arith.constant 0 : index
    %c0_66 = arith.constant 0 : index
    %85 = vector.load %arg6[%c0_65, %c0_66] : memref<4x8xf32, #tpu.memory_space<vmem>>, vector<4x8xf32>
    %cst_67 = arith.constant dense<0.000000e+00> : vector<32x8xf32>
    %86 = tpu.matmul %84, %85, %cst_67 {dimension_numbers = #tpu.dot_dimension_numbers<[1], [0], [0], [1], [0, 0, 1, 1], [], []>} : vector<32x4xf32>, vector<4x8xf32>, vector<32x8xf32> -> vector<32x8xf32>
    %c0_68 = arith.constant 0 : index
    %c0_69 = arith.constant 0 : index
    %87 = vector.load %arg7[%c0_68, %c0_69] : memref<1x8xf32, #tpu.memory_space<vmem>>, vector<1x8xf32>
    %88 = vector.broadcast %87 : vector<1x8xf32> to vector<32x8xf32>
    %89 = arith.mulf %86, %88 : vector<32x8xf32>
    %c0_70 = arith.constant 0 : index
    %c0_71 = arith.constant 0 : index
    %90 = vector.load %arg8[%c0_70, %c0_71] : memref<1x8xf32, #tpu.memory_space<vmem>>, vector<1x8xf32>
    %91 = vector.broadcast %90 : vector<1x8xf32> to vector<32x8xf32>
    %92 = arith.addf %89, %91 : vector<32x8xf32>
    %93 = vector.shape_cast %92 : vector<32x8xf32> to vector<4x8x8xf32>
    %c0_72 = arith.constant 0 : index
    %c0_73 = arith.constant 0 : index
    %c0_74 = arith.constant 0 : index
    %c0_75 = arith.constant 0 : index
    %94 = vector.load %arg10[%c0_72, %c0_73, %c0_74, %c0_75] : memref<1x4x8x8xf32, #tpu.memory_space<vmem>>, vector<1x4x8x8xf32>
    %95 = vector.shape_cast %94 : vector<1x4x8x8xf32> to vector<4x8x8xf32>
    %96 = vector.shape_cast %93 : vector<4x8x8xf32> to vector<1x4x8x8xf32>
    tpu.vector_store %arg10[%c0_72, %c0_73, %c0_74, %c0_75], %96 {strides = array<i32>} : memref<1x4x8x8xf32, #tpu.memory_space<vmem>>, vector<1x4x8x8xf32>,
    return
  }
  func.func @transform_0(%arg0: i32, %arg1: i32) -> (i32, i32, i32, i32) {
    %c0_i32 = arith.constant 0 : i32
    %c0_i32_0 = arith.constant 0 : i32
    %c0_i32_1 = arith.constant 0 : i32
    %c0_i32_2 = arith.constant 0 : i32
    return %arg0, %c0_i32, %c0_i32_0, %c0_i32_1 : i32, i32, i32, i32
  }
  func.func @transform_1(%arg0: i32, %arg1: i32) -> (i32, i32) {
    %c0_i32 = arith.constant 0 : i32
    %c0_i32_0 = arith.constant 0 : i32
    %c0_i32_1 = arith.constant 0 : i32
    return %c0_i32, %c0_i32_0 : i32, i32
  }
  func.func @transform_2(%arg0: i32, %arg1: i32) -> (i32, i32) {
    %c0_i32 = arith.constant 0 : i32
    %c0_i32_0 = arith.constant 0 : i32
    %c0_i32_1 = arith.constant 0 : i32
    return %c0_i32, %c0_i32_0 : i32, i32
  }
  func.func @transform_3(%arg0: i32, %arg1: i32) -> (i32, i32) {
    %c0_i32 = arith.constant 0 : i32
    %c0_i32_0 = arith.constant 0 : i32
    %c0_i32_1 = arith.constant 0 : i32
    return %c0_i32, %c0_i32_0 : i32, i32
  }
  func.func @transform_4(%arg0: i32, %arg1: i32) -> (i32, i32) {
    %c0_i32 = arith.constant 0 : i32
    %c0_i32_0 = arith.constant 0 : i32
    %c0_i32_1 = arith.constant 0 : i32
    return %c0_i32, %c0_i32_0 : i32, i32
  }
  func.func @transform_5(%arg0: i32, %arg1: i32) -> (i32, i32) {
    %c0_i32 = arith.constant 0 : i32
    %c0_i32_0 = arith.constant 0 : i32
    %c0_i32_1 = arith.constant 0 : i32
    return %c0_i32, %c0_i32_0 : i32, i32
  }
  func.func @transform_6(%arg0: i32, %arg1: i32) -> (i32, i32) {
    %c0_i32 = arith.constant 0 : i32
    %c0_i32_0 = arith.constant 0 : i32
    %c0_i32_1 = arith.constant 0 : i32
    return %c0_i32, %c0_i32_0 : i32, i32
  }
  func.func @transform_7(%arg0: i32, %arg1: i32) -> (i32, i32, i32, i32) {
    %c0_i32 = arith.constant 0 : i32
    %c0_i32_0 = arith.constant 0 : i32
    %c0_i32_1 = arith.constant 0 : i32
    return %arg0, %arg1, %c0_i32, %c0_i32_0 : i32, i32, i32, i32
  }
  func.func @transform_8(%arg0: i32, %arg1: i32) -> (i32, i32, i32, i32) {
    %c0_i32 = arith.constant 0 : i32
    %c0_i32_0 = arith.constant 0 : i32
    %c0_i32_1 = arith.constant 0 : i32
    return %arg0, %arg1, %c0_i32, %c0_i32_0 : i32, i32, i32, i32
  }
}

</mosaic_0001>

<bundles_post_ra>
// kernel: tpu_custom_call.1
= control target key start
LH: loop header
LB: loop body
LE: loop exit
PB: predicated region body
PF: predicated region fallthrough
CT: control target
= control target key end

     0   :  { %s1579_s0 = inlined_call_operand.vmem [shape: f32[2,36,9,4], index: 0, kind: input, shape index: {}]   ;;  %s1580_s1 = inlined_call_operand.vmem [shape: f32[36,8], index: 1, kind: input, shape index: {}]   ;;  %s1581_s2 = inlined_call_operand.vmem [shape: f32[1,8], index: 2, kind: input, shape index: {}]   ;;  %s1582_s3 = inlined_call_operand.vmem [shape: f32[1,8], index: 3, kind: input, shape index: {}]   ;;  %s1583_s4 = inlined_call_operand.vmem [shape: f32[4,8], index: 4, kind: input, shape index: {}]   ;;  %s1584_s5 = inlined_call_operand.vmem [shape: f32[1,8], index: 5, kind: input, shape index: {}]   ;;  %s1585_s6 = inlined_call_operand.vmem [shape: f32[1,8], index: 6, kind: input, shape index: {}]   ;;  %s1586_s7 = inlined_call_operand.hbm [shape: f32[2,8,8,8], index: 7, kind: output, shape index: {0}]   ;;  %s1587_s8 = inlined_call_operand.hbm [shape: f32[2,8,8,8], index: 8, kind: output, shape index: {1}]  }
   0x1   :  { %1593 = sst [smem:[#allocation11_spill]] %s1579_s0 }
   0x2   :  { %1594 = sst [smem:[#allocation12_spill]] %s1580_s1 }
   0x3   :  { %14 = vsyncpa [#allocation4], 0 }
   0x4   :  { %16 = vsyncpa [#allocation4 + $0x1], 0 }
   0x5   :  { %17 = vsyncpa [#allocation6], 0 }
   0x6   :  { %19 = vsyncpa [#allocation6 + $0x1], 0  ;;  %s1241_s27 = smov 0   ;;  %s1243_s28 = smov 0  }
   0x7   :  { %s1245_s29 = smov 0   ;;  %s1247_s30 = smov 0  }
   0x8   :  { %s1249_s9 = smov 0   ;;  %s1251_s10 = smov 0  }
   0x9   :  { %s1253_s11 = smov 0   ;;  %s1255_s12 = smov 0  }
   0xa LB: > { %1595 = sst [smem:[#allocation9_spill]] %s1177_s10  ;;  %s885_s13 = sadd.s32 4294967295, %s1185_s12   ;;  %s1185_s12 = sphi %s1255_s12, %s25_s12   ;;  %s1181_s11 = sphi %s1253_s11, %s1609_s11   ;;  %s1177_s10 = sphi %s1251_s10, %s1604_s10   ;;  %s1173_s9 = sphi %s1249_s9, %s1608_s9   ;;  %s1169_s30 = sphi %s1247_s30, %s1603_s30   ;;  %s1165_s29 = sphi %s1245_s29, %s1607_s29   ;;  %s1161_s28 = sphi %s1243_s28, %s1606_s28   ;;  %s1157_s27 = sphi %s1241_s27, %s1605_s27  }
   0xb   : > { %s886_s14 = sadd.s32 4294967294, %s1185_s12   ;;  %s34_s15 = sadd.s32 1, %s1177_s10 }
   0xc   : > { %p35_p0 = scmp.ge.s32.totalorder %s34_s15, 2  ;;  %s37_s16 = sadd.s32 1, %s1181_s11 }
   0xd   : > { %p208_p1 = scmp.ne.s32.totalorder %s1165_s29, %s1161_s28  ;;  %p209_p2 = scmp.eq.s32.totalorder %s885_s13, 3 }
   0xe   : > { %s1611_s15 = smov (%p35_p0, %s34_s15), 0  ;;  %s1613_s16 = smov (!%p35_p0, %s37_s16), %s1181_s11 }
   0xf   : > { %1596 = sst [smem:[#allocation10_spill]] %s1611_s15  ;;  %s194_s17 = ssub.s32 %s1177_s10, %s1611_s15 }
  0x10   : > { %p1292_p3 = por %p209_p2, %p208_p1  ;;  %p39_p4 = scmp.ge.s32.totalorder %s1613_s16, 2 }
  0x11   : > { %p214_p5 = scmp.ne.s32.totalorder %s1161_s28, %s1157_s27  ;;  %p215_p6 = scmp.eq.s32.totalorder %s886_s14, 3 }
  0x12   : > { %p889_p7 = scmp.ge.s32.totalorder %s1185_s12, 1  ;;  %s1615_s16 = smov (%p39_p4, %s1613_s16), 0 }
  0x13   : > { %p1301_p8 = por %p215_p6, %p214_p5  ;;  %p287_p9 = scmp.lt.s32.totalorder %s1185_s12, 5 }
  0x14   : > { %s193_s20 = ssub.s32 %s1181_s11, %s1615_s16  ;;  %s198_s21 = sadd.s32 1, %s1165_s29 }
  0x15   : > { %s195_s22 = sor.u32 %s194_s17, %s193_s20  ;;  %p288_p10 = pnand %p889_p7, %p287_p9 }
  0x16   : > { %p196_p11 = scmp.eq.s32.totalorder %s195_s22, 0  ;;  %p326_p12 = scmp.lt.s32.totalorder (!%p288_p10), %s1173_s9, 1 }
  0x17   : > { %291 = sbr.rel (%p288_p10) target bundleno = 374 (0x176), region = 48  ;;  %s957_s26 = sshll.u32 (!%p288_p10), %s1169_s30, 6 }
  0x18   : > { %s1310_s23 = scalar_select %p196_p11, %s1165_s29, %s198_s21  }
  0x19   : > { %s1599_s0 = sld [smem:[#allocation11_spill]] (!%p288_p10)  ;;  %s1187_s17 = smov (!%p288_p10), 4  }
  0x1a   : > { %s1188_s20 = smov (!%p288_p10), 12   ;;  %s1591_s21 = smov (!%p288_p10), 8  }
  0x1b   : > { %s1191_s22 = smov (!%p288_p10), 16   ;;  %s1600_s1 = sld [smem:[#allocation12_spill]] (!%p288_p10) }
  0x1c   : > { %s327_s24 = scalar_select %p326_p12, %s1173_s9, 1  ;;  %vm340_vm0 = vcmask 31744   ;;  %vm582_vm1 = vcmask 1043456   ;;  %vm368_vm2 = vcmask 64544   ;;  %vm393_vm3 = vcmask 97344  }
  0x1d   : > { %vm421_vm4 = vcmask 130144   ;;  %vm449_vm5 = vcmask 162944   ;;  %vm474_vm6 = vcmask 195744   ;;  %vm502_vm7 = vcmask 228544   ;;  %v644_v49 = vld [vmem:[%s1583_s4] sm:$0xf] }
  0x1e   : > { %s969_s25 = smul.u32 576, %s327_s24  ;;  %s1192_s24 = smov 24   ;;  %vm530_vm8 = vcmask 261344   ;;  %vm555_vm9 = vcmask 294144   ;;  %vm569_vm10 = vcmask 293888   ;;  %968 = vmatpush.msk.msra.mxu3 %vm582_vm1, %v644_v49  ;;  %942 = vmatpush.msk.msra.mxu1 %vm582_vm1, %v644_v49  ;;  %vm635_vm11 = vcmask 64512  }
  0x20   : > { %s330_s15 = scalar_lea.vmem %s1599_s0, %s969_s25  ;;  %s1193_s25 = smov 28  }
  0x21   : > { %s1318_s10 = scalar_lea.vmem %s330_s15, %s957_s26  ;;  %s1189_s15 = smov 20   ;;  %v568_v28 = vld [vmem:[%s1600_s1 + $0x20] sm:$0xf]  ;;  %v567_v30 = vld [vmem:[%s1600_s1 + $0x18] sm:$0xff]  ;;  %v566_v31 = vld [vmem:[%s1600_s1 + $0x10] sm:$0xff] }
  0x22   : > { %v1321_v0 = vld [vmem:[%s1318_s10 + $0xb0] sm:$0xff]  ;;  %v905_v1 = vld [vmem:[%s1318_s10 + $0x140] sm:$0xff]  ;;  %s1194_s26 = smov 32   ;;  %963 = vmatpush.msk.msra.mxu2 %vm582_vm1, %v568_v28  ;;  %933 = vmatpush.msk.msra.mxu0 %vm582_vm1, %v568_v28  ;;  %v565_v32 = vld [vmem:[%s1600_s1 + $0x8] sm:$0xff] }
  0x23   : > { %360 = vrot.lane.b32.xlu0 %v1321_v0, %s1187_s17  ;;  %413 = vrot.lane.b32.xlu1 %v905_v1, %s1188_s20  ;;  %v915_v2 = vld [vmem:[%s1318_s10 + $0x141] sm:$0xff]  ;;  %v1331_v4 = vld [vmem:[%s1318_s10 + $0x1d0] sm:$0xff] }
  0x24   : > { %466 = vrot.lane.b32.xlu2 %v915_v2, %s1189_s15  ;;  %v375_v3 = vld [vmem:[%s1318_s10 + $0x21] sm:$0xff]  ;;  %v921_v5 = vld [vmem:[%s1318_s10 + $0x30] sm:$0xff]  ;;  %964 = vmatpush.msra.mxu2 %v567_v30 }
  0x25   : > { %v897_v6 = vld [vmem:[%s1318_s10 + $0x90] sm:$0xff]  ;;  %v927_v7 = vld [vmem:[%s1318_s10 + $0xc0] sm:$0xff]  ;;  %344 = vst.msk [vmem:[#allocation2 + $0x18] sm:$0xff] %vm340_vm0, %v921_v5  ;;  %598 = vmatpush.msra.mxu0 %v567_v30 }
  0x26   : > { %v373_v8 = vld [vmem:[%s1318_s10 + $0x1] sm:$0xff]  ;;  %v931_v9 = vld [vmem:[%s1318_s10 + $0x31] sm:$0xff]  ;;  %965 = vmatpush.msra.mxu2 %v566_v31 }
  0x27   : > { %v903_v10 = vld [vmem:[%s1318_s10 + $0x120] sm:$0xff]  ;;  %v1350_v11 = vld [vmem:[%s1318_s10 + $0x1b0] sm:$0xff]  ;;  %599 = vmatpush.msra.mxu0 %v566_v31 }
  0x28   : > { %v906_v12 = vld [vmem:[%s1318_s10 + $0x150] sm:$0xff]  ;;  %v913_v13 = vld [vmem:[%s1318_s10 + $0x121] sm:$0xff]  ;;  %966 = vmatpush.msra.mxu2 %v565_v32  ;;  %943 = vmatmul.msk.f32.vlgmr.msra.gmra.mxu1 %vm340_vm0, %v1350_v11 }
  0x29   : > { %v1359_v14 = vld [vmem:[%s1318_s10 + $0x1e0] sm:$0xff]  ;;  %v919_v15 = vld [vmem:[%s1318_s10 + $0x10] sm:$0xff]  ;;  %600 = vmatpush.msra.mxu0 %v565_v32 }
  0x2a   : > { %v916_v16 = vld [vmem:[%s1318_s10 + $0x151] sm:$0xff]  ;;  %v925_v17 = vld [vmem:[%s1318_s10 + $0xa0] sm:$0xff]  ;;  %342 = vst.msk [vmem:[#allocation2 + $0x8] sm:$0xff] %vm340_vm0, %v919_v15 }
  0x2b   : > { %385 = vrot.lane.b32.xlu0 %v375_v3, %s1591_s21  ;;  %441 = vrot.lane.b32.xlu1 %v1331_v4, %s1191_s22  ;;  %v922_v18 = vld [vmem:[%s1318_s10 + $0x40] sm:$0xff]  ;;  %v929_v20 = vld [vmem:[%s1318_s10 + $0x11] sm:$0xff] }
  0x2c   : > { %494 = vrot.lane.b32.xlu2 %v921_v5, %s1192_s24  ;;  %v920_v19 = vld [vmem:[%s1318_s10 + $0x20] sm:$0xff]  ;;  %v928_v21 = vld [vmem:[%s1318_s10 + $0xd0] sm:$0xff] }
  0x2d   : > { %343 = vst.msk [vmem:[#allocation2 + $0x10] sm:$0xff] %vm340_vm0, %v920_v19  ;;  %v932_v22 = vld [vmem:[%s1318_s10 + $0x41] sm:$0xff]  ;;  %v904_v23 = vld [vmem:[%s1318_s10 + $0x130] sm:$0xff]  ;;  %v1468_v5 = vld [vmem:[%s1581_s2] ss:$0 sm:$0xff] }
  0x2e   : > { %v1387_v24 = vld [vmem:[%s1318_s10 + $0x1c0] sm:$0xff]  ;;  %v914_v25 = vld [vmem:[%s1318_s10 + $0x131] sm:$0xff] }
  0x2f   : > { %v336_v27 = vld [vmem:[%s1318_s10] sm:$0xff]  ;;  %944 = vmatmul.msk.f32.vlgmr.msra.gmra.mxu3 %vm340_vm0, %v1387_v24  ;;  %s950_s10 = sshll.u32 %s1173_s9, 3 }
  0x30   : > { %341 = vst.msk [vmem:[#allocation2] sm:$0xff] %vm340_vm0, %v336_v27  ;;  %v564_v33 = vld [vmem:[%s1600_s1] sm:$0xff] }
  0x31   : > { %967 = vmatpush.msra.mxu2 %v564_v33  ;;  %601 = vmatpush.msra.mxu0 %v564_v33 }
  0x33   : > { %356 = vrot.lane.b32.xlu0 %v897_v6, %s1187_s17  ;;  %522 = vrot.lane.b32.xlu1 %v927_v7, %s1193_s25  ;;  %v1476_v6 = vld [vmem:[%s1582_s3] ss:$0 sm:$0xff] }
  0x34   : > { %381 = vrot.lane.b32.xlu2 %v373_v8, %s1591_s21 }
  0x37   : > { %945 = vmatmul.msk.f32.gmra.mxu3 %vm340_vm0, %v1331_v4 }
  0x3b   : > { %547 = vrot.lane.b32.xlu0 %v931_v9, %s1194_s26  ;;  %362 = vrot.lane.b32.xlu1 %v927_v7, %s1187_s17 }
  0x3c   : > { %409 = vrot.lane.b32.xlu2 %v903_v10, %s1188_s20  ;;  %v1058_v10 = vld [vmem:[%s1585_s6] ss:$0 sm:$0xff] }
  0x3f   : > { %946 = vmatmul.msk.f32.gmra.mxu3 %vm340_vm0, %v1359_v14 }
  0x43   : > { %387 = vrot.lane.b32.xlu0 %v931_v9, %s1591_s21  ;;  %437 = vrot.lane.b32.xlu1 %v1350_v11, %s1191_s22  ;;  %v1057_v9 = vld [vmem:[%s1584_s5] ss:$0 sm:$0xff] }
  0x44   : > { %415 = vrot.lane.b32.xlu2 %v906_v12, %s1188_s20 }
  0x4b   : > { %462 = vrot.lane.b32.xlu0 %v913_v13, %s1189_s15  ;;  %443 = vrot.lane.b32.xlu1 %v1359_v14, %s1191_s22 }
  0x4c   : > { %490 = vrot.lane.b32.xlu2 %v919_v15, %s1192_s24 }
  0x53   : > { %468 = vrot.lane.b32.xlu0 %v916_v16, %s1189_s15  ;;  %518 = vrot.lane.b32.xlu1 %v925_v17, %s1193_s25 }
  0x54   : > { %496 = vrot.lane.b32.xlu2 %v922_v18, %s1192_s24 }
  0x5b   : > { %543 = vrot.lane.b32.xlu0 %v929_v20, %s1194_s26  ;;  %358 = vrot.lane.b32.xlu1 %v925_v17, %s1187_s17 }
  0x5c   : > { %524 = vrot.lane.b32.xlu2 %v928_v21, %s1193_s25 }
  0x63   : > { %383 = vrot.lane.b32.xlu0 %v929_v20, %s1591_s21  ;;  %549 = vrot.lane.b32.xlu1 %v932_v22, %s1194_s26 }
  0x64   : > { %411 = vrot.lane.b32.xlu2 %v904_v23, %s1188_s20 }
  0x6b   : > { %439 = vrot.lane.b32.xlu0 %v1387_v24, %s1191_s22  ;;  %464 = vrot.lane.b32.xlu1 %v914_v25, %s1189_s15  ;;  %s1471_s15 = sand.u32 1, %s1161_s28   ;;  %s949_s22 = sshll.u32 %s1169_s30, 2 }
  0x6c   : > { %492 = vrot.lane.b32.xlu2 %v920_v19, %s1192_s24  ;;  %s890_s24 = sshll.u32 %s1471_s15, 5 }
  0x6d   : > { %s1487_s17 = scalar_lea.vmem [#allocation3], %s890_s24  ;;  %s325_s20 = scalar_lea.vmem [#allocation5], %s890_s24 }
  0x6e   : > { %s748_s30 = sshll.u32 %s325_s20, 4  ;;  %s749_s30 = int_to_ptr.vmem [resolvable:$true] %s748_s30 }
  0x73   : > { %520 = vrot.lane.b32.xlu0 %v1321_v0, %s1193_s25  ;;  %545 = vrot.lane.b32.xlu1 %v375_v3, %s1194_s26  ;;  %s1494_s25 = sadd.s32 %s950_s10, %s949_s22  ;;  %s715_s22 = scalar_lea.sflag [#allocation6], %s1471_s15 }
  0x74   : > { %s1590_s26 = sshll.u32 %s1494_s25, 3 }
  0x75   : > { %s747_s24 = scalar_lea.hbm %s1587_s8, %s1590_s26  ;;  %s1079_s26 = scalar_lea.hbm %s1587_s8, 128 }
  0x76   : > { %s750_s9 = sshll.u32 %s747_s24, 4  ;;  %s751_s9 = int_to_ptr.hbm [resolvable:$true] %s750_s9 }
  0x77   : > { %s1073_s10 = sshra.s32 %s751_s9, 4  ;;  %s1074_s10 = int_to_ptr.hbm [resolvable:$true] %s1073_s10 }
  0x78   : > { %s1075_s13 = scalar_lea.hbm %s1074_s10, 32  ;;  %p1080_p2 = scmp.lt.s32.totalorder %s1074_s10, %s1587_s8 }
  0x79   : > { %p1076_p13 = scmp.ne.s32.totalorder %s1074_s10, %s1075_s13  ;;  %p1081_p4 = scmp.lt.s32.totalorder %s1079_s26, %s1075_s13 }
  0x7b   : > { %p1077_p0 = pnand %p1076_p13, %p1292_p3  ;;  %p1082_p5 = por %p1081_p4, %p1080_p2 }
  0x7d   : > { %p1078_p1 = pneg %p1077_p0 }
  0x7e   : > { %v467_v26 = vpop.permute.xlu2 %466 }
  0x7f   : > { %p1083_p6 = pnand %p1082_p5, %p1078_p1 }
  0x86   : > { %v495_v29 = vpop.permute.xlu2 %494 }
  0x8e   : > { %v382_v34 = vpop.permute.xlu2 %381 }
  0x95   : > { %v361_v35 = vpop.permute.xlu0 %360  ;;  %v414_v36 = vpop.permute.xlu1 %413 }
  0x96   : > { %371 = vst.msk [vmem:[#allocation2 + $0x10] sm:$0xff] %vm368_vm2, %v361_v35  ;;  %v410_v39 = vpop.permute.xlu2 %409 }
  0x9d   : > { %v386_v37 = vpop.permute.xlu0 %385  ;;  %v442_v38 = vpop.permute.xlu1 %441 }
  0x9e   : > { %396 = vst.msk [vmem:[#allocation2 + $0x10] sm:$0xff] %vm393_vm3, %v386_v37  ;;  %v416_v42 = vpop.permute.xlu2 %415 }
  0x9f   : > { %424 = vst.msk [vmem:[#allocation2 + $0x10] sm:$0xff] %vm421_vm4, %v414_v36 }
  0xa0   : > { %452 = vst.msk [vmem:[#allocation2 + $0x10] sm:$0xff] %vm449_vm5, %v442_v38 }
  0xa1   : > { %477 = vst.msk [vmem:[#allocation2 + $0x10] sm:$0xff] %vm474_vm6, %v467_v26 }
  0xa2   : > { %505 = vst.msk [vmem:[#allocation2 + $0x10] sm:$0xff] %vm502_vm7, %v495_v29 }
  0xa5   : > { %v357_v40 = vpop.permute.xlu0 %356  ;;  %v523_v41 = vpop.permute.xlu1 %522 }
  0xa6   : > { %369 = vst.msk [vmem:[#allocation2] sm:$0xff] %vm368_vm2, %v357_v40  ;;  %v491_v45 = vpop.permute.xlu2 %490  ;;  %v677_v19 = vpop.f32.mrf.mxu1 }
  0xa7   : > { %533 = vst.msk [vmem:[#allocation2 + $0x10] sm:$0xff] %vm530_vm8, %v523_v41  ;;  %v693_v21 = vmul.f32 %v1057_v9, %v677_v19 }
  0xa8   : > { %394 = vst.msk [vmem:[#allocation2] sm:$0xff] %vm393_vm3, %v382_v34 }
  0xa9   : > { %422 = vst.msk [vmem:[#allocation2] sm:$0xff] %vm421_vm4, %v410_v39  ;;  %v701_v23 = vadd.f32 %v1058_v10, %v693_v21 }
  0xab   : > { %705 = vst.msk [vmem:[%s325_s20] sm:$0xff] %vm635_vm11, %v701_v23 }
  0xad   : > { %v548_v43 = vpop.permute.xlu0 %547  ;;  %v363_v44 = vpop.permute.xlu1 %362 }
  0xae   : > { %558 = vst.msk [vmem:[#allocation2 + $0x10] sm:$0xff] %vm555_vm9, %v548_v43  ;;  %v497_v50 = vpop.permute.xlu2 %496 }
  0xaf   : > { %372 = vst.msk [vmem:[#allocation2 + $0x18] sm:$0xff] %vm368_vm2, %v363_v44 }
  0xb2   : > { %v680_v12 = vpop.f32.mrf.mxu3 }
  0xb3   : > { %v694_v13 = vmul.f32 %v1057_v9, %v680_v12 }
  0xb5   : > { %v388_v46 = vpop.permute.xlu0 %387  ;;  %v438_v47 = vpop.permute.xlu1 %437  ;;  %v562_v48 = vld [vmem:[#allocation2 + $0x10] sm:$0xff]  ;;  %v702_v15 = vadd.f32 %v1058_v10, %v694_v13 }
  0xb6   : > { %397 = vst.msk [vmem:[#allocation2 + $0x18] sm:$0xff] %vm393_vm3, %v388_v46  ;;  %936 = vmatmul.msk.f32.vlgmr.msra.gmra.mxu2 %vm569_vm10, %v562_v48  ;;  %v525_v55 = vpop.permute.xlu2 %524 }
  0xb7   : > { %450 = vst.msk [vmem:[#allocation2] sm:$0xff] %vm449_vm5, %v438_v47 }
  0xb8   : > { %425 = vst.msk [vmem:[#allocation2 + $0x18] sm:$0xff] %vm421_vm4, %v416_v42 }
  0xb9   : > { %706 = vst.msk [vmem:[%s325_s20 + $0x8] sm:$0xff] %vm635_vm11, %v702_v15 }
  0xba   : > { %v683_v16 = vpop.f32.mrf.mxu3 }
  0xbb   : > { %v695_v17 = vmul.f32 %v1057_v9, %v683_v16 }
  0xbd   : > { %v463_v51 = vpop.permute.xlu0 %462  ;;  %v444_v52 = vpop.permute.xlu1 %443  ;;  %v703_v18 = vadd.f32 %v1058_v10, %v695_v17 }
  0xbe   : > { %475 = vst.msk [vmem:[#allocation2] sm:$0xff] %vm474_vm6, %v463_v51  ;;  %v412_v58 = vpop.permute.xlu2 %411 }
  0xbf   : > { %453 = vst.msk [vmem:[#allocation2 + $0x18] sm:$0xff] %vm449_vm5, %v444_v52 }
  0xc0   : > { %503 = vst.msk [vmem:[#allocation2] sm:$0xff] %vm502_vm7, %v491_v45 }
  0xc1   : > { %707 = vst.msk [vmem:[%s325_s20 + $0x10] sm:$0xff] %vm635_vm11, %v703_v18 }
  0xc2   : > { %v686_v20 = vpop.f32.mrf.mxu3 }
  0xc3   : > { %v696_v22 = vmul.f32 %v1057_v9, %v686_v20 }
  0xc5   : > { %v469_v53 = vpop.permute.xlu0 %468  ;;  %v519_v54 = vpop.permute.xlu1 %518  ;;  %v704_v24 = vadd.f32 %v1058_v10, %v696_v22 }
  0xc6   : > { %478 = vst.msk [vmem:[#allocation2 + $0x18] sm:$0xff] %vm474_vm6, %v469_v53  ;;  %v493_v62 = vpop.permute.xlu2 %492 }
  0xc7   : > { %531 = vst.msk [vmem:[#allocation2] sm:$0xff] %vm530_vm8, %v519_v54 }
  0xc8   : > { %506 = vst.msk [vmem:[#allocation2 + $0x18] sm:$0xff] %vm502_vm7, %v497_v50 }
  0xc9   : > { %534 = vst.msk [vmem:[#allocation2 + $0x18] sm:$0xff] %vm530_vm8, %v525_v55 }
  0xca   : > { %708 = vst.msk [vmem:[%s325_s20 + $0x18] sm:$0xff] %vm635_vm11, %v704_v24 }
  0xcd   : > { %v544_v56 = vpop.permute.xlu0 %543  ;;  %v359_v57 = vpop.permute.xlu1 %358 }
  0xce   : > { %556 = vst.msk [vmem:[#allocation2] sm:$0xff] %vm555_vm9, %v544_v56 }
  0xcf   : > { %370 = vst.msk [vmem:[#allocation2 + $0x8] sm:$0xff] %vm368_vm2, %v359_v57 }
  0xd5   : > { %v384_v59 = vpop.permute.xlu0 %383  ;;  %v550_v60 = vpop.permute.xlu1 %549  ;;  %v560_v61 = vld [vmem:[#allocation2] sm:$0xff] }
  0xd6   : > { %395 = vst.msk [vmem:[#allocation2 + $0x8] sm:$0xff] %vm393_vm3, %v384_v59  ;;  %934 = vmatmul.msk.f32.vlgmr.msra.gmra.mxu0 %vm569_vm10, %v560_v61 }
  0xd7   : > { %559 = vst.msk [vmem:[#allocation2 + $0x18] sm:$0xff] %vm555_vm9, %v550_v60 }
  0xd8   : > { %423 = vst.msk [vmem:[#allocation2 + $0x8] sm:$0xff] %vm421_vm4, %v412_v58 }
  0xdd   : > { %v440_v63 = vpop.permute.xlu0 %439  ;;  %v465_v0 = vpop.permute.xlu1 %464 }
  0xde   : > { %451 = vst.msk [vmem:[#allocation2 + $0x8] sm:$0xff] %vm449_vm5, %v440_v63  ;;  %v563_v1 = vld [vmem:[#allocation2 + $0x18] sm:$0xff] }
  0xdf   : > { %476 = vst.msk [vmem:[#allocation2 + $0x8] sm:$0xff] %vm474_vm6, %v465_v0  ;;  %937 = vmatmul.msk.f32.gmra.mxu2 %vm569_vm10, %v563_v1 }
  0xe0   : > { %504 = vst.msk [vmem:[#allocation2 + $0x8] sm:$0xff] %vm502_vm7, %v493_v62 }
  0xe5   : > { %v521_v2 = vpop.permute.xlu0 %520  ;;  %v546_v3 = vpop.permute.xlu1 %545 }
  0xe6   : > { %532 = vst.msk [vmem:[#allocation2 + $0x8] sm:$0xff] %vm530_vm8, %v521_v2 }
  0xe7   : > { %557 = vst.msk [vmem:[#allocation2 + $0x8] sm:$0xff] %vm555_vm9, %v546_v3 }
  0xee   : > { %v561_v4 = vld [vmem:[#allocation2 + $0x8] sm:$0xff] }
  0xef   : > { %935 = vmatmul.msk.f32.gmra.mxu0 %vm569_vm10, %v561_v4 }
 0x139   : > { %v609_v7 = vpop.f32.mrf.mxu2 }
 0x13a   : > { %v621_v8 = vmul.f32 %v1468_v5, %v609_v7 }
 0x13c   : > { %v629_v11 = vadd.f32 %v1476_v6, %v621_v8 }
 0x13e   : > { %v633_v14 = vmax.f32 %v629_v11, 0.0 }
 0x140   : > { %638 = vst.msk [vmem:[%s1487_s17 + $0x10] sm:$0xff] %vm635_vm11, %v633_v14 }
 0x153   : > { %v603_v25 = vpop.f32.mrf.mxu0 }
 0x154   : > { %v619_v26 = vmul.f32 %v1468_v5, %v603_v25 }
 0x155   : > { %1086 = shalt.err (!%p1083_p6)
}
 0x156   : > { %s1195_s20 = smov 128   ;;  %s1601_s1 = smov 8   ;;  %v627_v27 = vadd.f32 %v1476_v6, %v619_v26 }
 0x157   : > { %971 = dma.vmem_to_hbm [thread:$0]  (%p1292_p3), %s749_s30, 512, %s751_s9, %s715_s22, %s1195_s20, %s1195_s20, %s1601_s1  }
 0x158   : > { %v631_v28 = vmax.f32 %v627_v27, 0.0  ;;  %s1602_s0 = sshll.u32 %s1494_s25, 3  ;;  %s729_s9 = sshll.u32 %s1487_s17, 4  ;;  %s730_s9 = int_to_ptr.vmem [resolvable:$true] %s729_s9 }
 0x159   : > { %s728_s30 = scalar_lea.hbm %s1586_s7, %s1602_s0  ;;  %s710_s10 = scalar_lea.sflag [#allocation4], %s1471_s15 }
 0x15a   : > { %636 = vst.msk [vmem:[%s1487_s17] sm:$0xff] %vm635_vm11, %v631_v28  ;;  %s731_s22 = sshll.u32 %s728_s30, 4  ;;  %s1107_s0 = scalar_lea.hbm %s1586_s7, 128  ;;  %s732_s22 = int_to_ptr.hbm [resolvable:$true] %s731_s22 }
 0x15b   : > { %s1101_s13 = sshra.s32 %s732_s22, 4  ;;  %s1102_s13 = int_to_ptr.hbm [resolvable:$true] %s1101_s13 }
 0x15c   : > { %s1103_s25 = scalar_lea.hbm %s1102_s13, 32  ;;  %p1108_p11 = scmp.lt.s32.totalorder %s1102_s13, %s1586_s7 }
 0x15d   : > { %p1104_p7 = scmp.ne.s32.totalorder %s1102_s13, %s1103_s25  ;;  %p1109_p12 = scmp.lt.s32.totalorder %s1107_s0, %s1103_s25 }
 0x15f   : > { %p1105_p9 = pnand %p1104_p7, %p1292_p3  ;;  %p1110_p13 = por %p1109_p12, %p1108_p11 }
 0x161   : > { %p1106_p10 = pneg %p1105_p9 }
 0x162   : > { %v612_v29 = vpop.f32.mrf.mxu2 }
 0x163   : > { %v622_v30 = vmul.f32 %v1468_v5, %v612_v29  ;;  %p1111_p0 = pnand %p1110_p13, %p1106_p10 }
 0x165   : > { %v630_v31 = vadd.f32 %v1476_v6, %v622_v30 }
 0x167   : > { %v634_v32 = vmax.f32 %v630_v31, 0.0 }
 0x169   : > { %639 = vst.msk [vmem:[%s1487_s17 + $0x18] sm:$0xff] %vm635_vm11, %v634_v32 }
 0x16c   : > { %v606_v33 = vpop.f32.mrf.mxu0 }
 0x16d   : > { %v620_v34 = vmul.f32 %v1468_v5, %v606_v33 }
 0x16f   : > { %v628_v35 = vadd.f32 %v1476_v6, %v620_v34 }
 0x171   : > { %v632_v36 = vmax.f32 %v628_v35, 0.0 }
 0x173   : > { %637 = vst.msk [vmem:[%s1487_s17 + $0x8] sm:$0xff] %vm635_vm11, %v632_v36 }
 0x174   : > { %1114 = shalt.err (!%p1111_p0)
}
 0x175   : > { %970 = dma.vmem_to_hbm [thread:$0]  (%p1292_p3), %s730_s9, 512, %s732_s22, %s710_s10, %s1195_s20, %s1195_s20, %s1601_s1  }
 0x176 PF: > { %p981_p1 = scmp.ge.s32.totalorder %s1185_s12, 2  ;;  %s765_s15 = sand.u32 1, %s1157_s27  }
 0x177   : > { %s766_s17 = scalar_lea.sflag [#allocation4], %s765_s15 }
 0x178   : > { %p975_p2 = pnand %p981_p1, %p1301_p8 }
 0x17a   : > { %p976_p4 = pneg %p975_p2 }
 0x17c   : > { %1148 = dma.done.wait (%p976_p4), %s766_s17, 512  }
 0x17d   : > { %1150 = vsyncadd (%p976_p4), %s766_s17, 4294966784  ;;  %s776_s30 = scalar_lea.sflag [#allocation6], %s765_s15 }
 0x17e   : > { %1152 = dma.done.wait (%p976_p4), %s776_s30, 512  }
 0x17f   : > { %1154 = vsyncadd (%p976_p4), %s776_s30, 4294966784  ;;  %s25_s12 = sadd.s32 1, %s1185_s12   ;;  %s1603_s30 = sld [smem:[#allocation9_spill]] }
 0x180   : > { %p22_p5 = scmp.ge.s32.totalorder %s25_s12, 6   ;;  %s1604_s10 = sld [smem:[#allocation10_spill]] }
 0x181   : > { %s1605_s27 = smov %s1161_s28  ;;  %s1606_s28 = smov %s1165_s29 }
 0x182   : > { %s1607_s29 = smov %s1310_s23  ;;  %s1608_s9 = smov %s1181_s11 }
 0x183   : > { %s1609_s11 = smov %s1615_s16  ;;  %24 = sbr.rel (!%p22_p5) target bundleno = 10 (0xa), region = 106 }
 0x188   :  { %782 = vsyncpa [#allocation4], 1 }
 0x189   :  { %784 = vsyncpa [#allocation4 + $0x1], 1 }
 0x18a   :  { %785 = vsyncpa [#allocation6], 1 }
 0x18b   :  { %787 = vsyncpa [#allocation6 + $0x1], 1 }

</bundles_post_ra>
